<compile_context>
chip_gen: v5e
topology: v5e:2x2
jax: 0.10.0
libtpu: 0.0.40
codegen_flags: <defaults>
</compile_context>

<pallas_src>
import functools

import jax
import jax.numpy as jnp
from jax.experimental import pallas as pl
from jax.experimental.pallas import tpu as pltpu

_LANES = 128
_SUBLANES = 8
# Whole-slab-resident fast path: 3 arrays x 2 pipeline buffers x slab bytes must
# stay under the 32 MiB VMEM limit we set (safe on v5e/v6e/v7x).
_MAX_RESIDENT_ROWS = 8192        # 8192 * 128 * 4 B = 4 MiB/slab -> <= 24 MiB total
_DEFAULT_TILE_ROWS = 4096        # fallback: 2 MiB/block, 3 specs x 2 bufs = 12 MiB


def _lane_fold(v, channels):
    """(1,128) per-lane vector -> per-channel totals replicated across lanes.

    Row-major (T, C) flattening puts channel l % C in lane l; C divides 128 (so
    128/C is a power of two) and a log-step rotate-and-add on the XLU sums all
    lanes congruent mod C without any reshape/transpose.
    """
    shift = channels
    while shift < _LANES:
        v = v + pltpu.roll(v, shift=shift, axis=1)
        shift *= 2
    return v


def _fused_kernel(k_ref, s_ref, n_ref, out_ref, es_ref, en_ref, scale_ref,
                  *, channels, valid_rows, tile_rows):
    p = pl.program_id(0)   # 0: energy reduction, 1: scale + apply
    i = pl.program_id(1)   # row-tile index

    @pl.when(jnp.logical_and(p == 0, i == 0))
    def _init():
        es_ref[...] = jnp.zeros_like(es_ref)
        en_ref[...] = jnp.zeros_like(en_ref)

    @pl.when(p == 0)
    def _accumulate():
        s = s_ref[...]
        n = n_ref[...]
        if valid_rows % tile_rows != 0:
            # Ragged edge block: out-of-bounds reads are unspecified -> zero them
            # before squaring so they do not corrupt the energies.
            row = i * tile_rows + jax.lax.broadcasted_iota(jnp.int32, s.shape, 0)
            keep = row < valid_rows
            s = jnp.where(keep, s, 0.0)
            n = jnp.where(keep, n, 0.0)
        es_ref[...] += jnp.sum(s * s, axis=0, keepdims=True)   # (1, 128)
        en_ref[...] += jnp.sum(n * n, axis=0, keepdims=True)   # (1, 128)

    @pl.when(jnp.logical_and(p == 1, i == 0))
    def _make_scale():
        e_s = _lane_fold(es_ref[...], channels)    # per-channel E_s, lane-tiled
        e_n = _lane_fold(en_ref[...], channels)    # per-channel E_n, lane-tiled
        # scale = sqrt(E_s/E_n) * 10**(-snr/20); E_n == 0 degenerates (inf/NaN)
        # exactly like the torch reference's log10(0).
        scale_ref[...] = jnp.sqrt(e_s / e_n) * k_ref[0]

    @pl.when(p == 1)
    def _apply():
        out_ref[...] = s_ref[...] + scale_ref[...] * n_ref[...]


def add_noise_pallas(speech_tc, noise_tc, snr_db, *, tile_rows=None):
    """AddNoise.forward: speech (T, C) f32 -> noisy speech (T, C) f32.

    noise_tc is white Gaussian noise of the same (T, C) shape (the module draws
    it internally with torch.randn); snr_db is the target SNR in dB.
    `tile_rows` is a testing knob; leave None in production (resident fast path
    for typical utterances, 4096-row tiles otherwise).
    """
    T, C = speech_tc.shape
    assert _LANES % C == 0, "channel count must divide 128 for the lane-dense view"

    n_elems = T * C
    rows = pl.cdiv(n_elems, _LANES)

    def to_slab(x):
        flat = x.astype(jnp.float32).reshape(-1)        # free contiguous view
        pad = rows * _LANES - n_elems
        if pad:
            # TODO(synk): awkward sizes (T*C % 128 != 0) pay one XLA pad copy.
            flat = jnp.pad(flat, (0, pad))
        return flat.reshape(rows, _LANES)

    s_slab = to_slab(speech_tc)
    n_slab = to_slab(noise_tc)

    if tile_rows is None:
        tile_rows = rows if rows <= _MAX_RESIDENT_ROWS else _DEFAULT_TILE_ROWS
    tile_rows = min(tile_rows, rows)
    if tile_rows != rows:                               # tiled path: 8-sublane blocks
        tile_rows = max(_SUBLANES, (tile_rows // _SUBLANES) * _SUBLANES)
    num_tiles = pl.cdiv(rows, tile_rows)

    # k = 10**(-snr/20); one scalar op, read from SMEM inside the kernel.
    k = jnp.power(jnp.float32(10.0),
                  -jnp.asarray(snr_db, jnp.float32) / jnp.float32(20.0)).reshape(1)

    kernel = functools.partial(_fused_kernel, channels=C, valid_rows=rows,
                               tile_rows=tile_rows)

    out_slab = pl.pallas_call(
        kernel,
        out_shape=jax.ShapeDtypeStruct((rows, _LANES), jnp.float32),
        grid=(2, num_tiles),
        in_specs=[
            pl.BlockSpec(memory_space=pltpu.MemorySpace.SMEM),            # k scalar
            pl.BlockSpec((tile_rows, _LANES), lambda p, i: (i, 0)),       # speech
            pl.BlockSpec((tile_rows, _LANES), lambda p, i: (i, 0)),       # noise
        ],
        # Pass 0 parks the output window on block 0 (index never changes, so it is
        # never written back); pass 1 walks the tiles so every output block is
        # written to HBM exactly once.
        out_specs=pl.BlockSpec((tile_rows, _LANES), lambda p, i: (i * p, 0)),
        scratch_shapes=[pltpu.VMEM((1, _LANES), jnp.float32),    # E_s per lane
                        pltpu.VMEM((1, _LANES), jnp.float32),    # E_n per lane
                        pltpu.VMEM((1, _LANES), jnp.float32)],   # scale per lane
        compiler_params=pltpu.CompilerParams(
            dimension_semantics=("arbitrary", "arbitrary"),
            vmem_limit_bytes=32 * 1024 * 1024),
    )(k, s_slab, n_slab)

    out = out_slab.reshape(-1)
    if rows * _LANES != n_elems:
        out = out[:n_elems]
    return out.reshape(T, C)


def add_noise_reference(speech_tc, noise_tc, snr_db):
    """Pure-JAX mirror of the torchaudio.functional.add_noise path."""
    s = speech_tc.T
    n = noise_tc.T
    e_s = jnp.sum(s * s, axis=-1, keepdims=True)
    e_n = jnp.sum(n * n, axis=-1, keepdims=True)
    original_snr_db = 10.0 * (jnp.log10(e_s) - jnp.log10(e_n))
    scale = 10.0 ** ((original_snr_db - jnp.float32(snr_db)) / 20.0)
    return (s + scale * n).T


if __name__ == "__main__":
    key = jax.random.PRNGKey(0)
    k_speech, k_noise, k_snr = jax.random.split(key, 3)

    # Small deterministic (T, C) 16 kHz-style example.
    T, C = 4096, 4
    speech = jax.random.normal(k_speech, (T, C), dtype=jnp.float32)
    # White-noise branch: the module draws torch.randn of speech's size.
    noise = jax.random.normal(k_noise, (T, C), dtype=jnp.float32)

    snr_levels = [-5.0, 0.0, 5.0, 10.0, 15.0, 20.0, 999999.0]
    snr_db = snr_levels[int(jax.random.randint(k_snr, (), 0, len(snr_levels)))]

    # Production path: whole slab resident, single fused launch, 3 HBM passes.
    out = jax.block_until_ready(add_noise_pallas(speech, noise, snr_db))
    ref = add_noise_reference(speech, noise, snr_db)
    assert out.shape == (T, C)
    assert jnp.allclose(out, ref, rtol=1e-4, atol=1e-4), "mismatch vs reference"

    # Sentinel SNR (999999): scale underflows to 0 -> output bit-equal to speech.
    out_clean = jax.block_until_ready(add_noise_pallas(speech, noise, 999999.0))
    assert jnp.array_equal(out_clean, speech), "sentinel SNR must leave speech untouched"

    # Correctness-only exercise of the tiled fallback (multi-tile grid + ragged
    # edge-row masking).  Tiny tiles are NOT a production configuration.
    T2 = 4128                                  # rows = 129 -> 5 tiles of 32, ragged edge
    speech2 = jax.random.normal(k_speech, (T2, C), dtype=jnp.float32)
    noise2 = jax.random.normal(k_noise, (T2, C), dtype=jnp.float32)
    out2 = jax.block_until_ready(add_noise_pallas(speech2, noise2, 5.0, tile_rows=32))
    ref2 = add_noise_reference(speech2, noise2, 5.0)
    assert jnp.allclose(out2, ref2, rtol=1e-4, atol=1e-4), "tiled path mismatch"

    print("KERNEL_OK")
</pallas_src>

<mosaic_0001>
module attributes {stable_mosaic.version = 11 : i64} {
  func.func @_fused_kernel(%arg0: i32, %arg1: i32, %arg2: memref<1xf32, #tpu.memory_space<smem>>, %arg3: memref<128x128xf32, #tpu.memory_space<vmem>>, %arg4: memref<128x128xf32, #tpu.memory_space<vmem>>, %arg5: memref<128x128xf32, #tpu.memory_space<vmem>>, %arg6: memref<1x128xf32, #tpu.memory_space<vmem>>, %arg7: memref<1x128xf32, #tpu.memory_space<vmem>>, %arg8: memref<1x128xf32, #tpu.memory_space<vmem>>) attributes {dimension_semantics = [#tpu.dimension_semantics<arbitrary>, #tpu.dimension_semantics<arbitrary>], iteration_bounds = array<i64: 2, 1>, scalar_prefetch = 0 : i64, scratch_operands = 3 : i64, tpu.core_type = #tpu.core_type<tc>, window_params = [{transform_indices = @transform_0, window_bounds = array<i64: 1>}, {transform_indices = @transform_1, window_bounds = array<i64: 128, 128>}, {transform_indices = @transform_2, window_bounds = array<i64: 128, 128>}, {transform_indices = @transform_3, window_bounds = array<i64: 128, 128>}]} {
    %c0_i32 = arith.constant 0 : i32
    %0 = arith.cmpi eq, %arg0, %c0_i32 : i32
    %c0_i32_0 = arith.constant 0 : i32
    %1 = arith.cmpi eq, %arg1, %c0_i32_0 : i32
    %2 = arith.andi %0, %1 : i1
    %3 = arith.extui %2 : i1 to i32
    %c0_i32_1 = arith.constant 0 : i32
    %4 = arith.cmpi ne, %3, %c0_i32_1 : i32
    scf.if %4 {
      %cst = arith.constant 0.000000e+00 : f32
      %16 = vector.broadcast %cst : f32 to vector<1x128xf32>
      %c0 = arith.constant 0 : index
      %c0_8 = arith.constant 0 : index
      %17 = vector.load %arg6[%c0, %c0_8] : memref<1x128xf32, #tpu.memory_space<vmem>>, vector<1x128xf32>
      tpu.vector_store %arg6[%c0, %c0_8], %16 {strides = array<i32>} : memref<1x128xf32, #tpu.memory_space<vmem>>, vector<1x128xf32>,
      %cst_9 = arith.constant 0.000000e+00 : f32
      %18 = vector.broadcast %cst_9 : f32 to vector<1x128xf32>
      %c0_10 = arith.constant 0 : index
      %c0_11 = arith.constant 0 : index
      %19 = vector.load %arg7[%c0_10, %c0_11] : memref<1x128xf32, #tpu.memory_space<vmem>>, vector<1x128xf32>
      tpu.vector_store %arg7[%c0_10, %c0_11], %18 {strides = array<i32>} : memref<1x128xf32, #tpu.memory_space<vmem>>, vector<1x128xf32>,
    } else {
    }
    %c0_i32_2 = arith.constant 0 : i32
    %5 = arith.cmpi eq, %arg0, %c0_i32_2 : i32
    %6 = arith.extui %5 : i1 to i32
    %c0_i32_3 = arith.constant 0 : i32
    %7 = arith.cmpi ne, %6, %c0_i32_3 : i32
    scf.if %7 {
      %c0 = arith.constant 0 : index
      %c0_8 = arith.constant 0 : index
      %16 = vector.load %arg3[%c0, %c0_8] : memref<128x128xf32, #tpu.memory_space<vmem>>, vector<128x128xf32>
      %c0_9 = arith.constant 0 : index
      %c0_10 = arith.constant 0 : index
      %17 = vector.load %arg4[%c0_9, %c0_10] : memref<128x128xf32, #tpu.memory_space<vmem>>, vector<128x128xf32>
      %c0_11 = arith.constant 0 : index
      %c0_12 = arith.constant 0 : index
      %18 = vector.load %arg6[%c0_11, %c0_12] : memref<1x128xf32, #tpu.memory_space<vmem>>, vector<1x128xf32>
      %19 = arith.mulf %16, %16 : vector<128x128xf32>
      %cst = arith.constant dense<0.000000e+00> : vector<128xf32>
      %20 = vector.multi_reduction <add>, %19, %cst [0] : vector<128x128xf32> to vector<128xf32>
      %21 = vector.shape_cast %20 : vector<128xf32> to vector<1x128xf32>
      %22 = arith.addf %18, %21 : vector<1x128xf32>
      %c0_13 = arith.constant 0 : index
      %c0_14 = arith.constant 0 : index
      %23 = vector.load %arg6[%c0_13, %c0_14] : memref<1x128xf32, #tpu.memory_space<vmem>>, vector<1x128xf32>
      tpu.vector_store %arg6[%c0_13, %c0_14], %22 {strides = array<i32>} : memref<1x128xf32, #tpu.memory_space<vmem>>, vector<1x128xf32>,
      %c0_15 = arith.constant 0 : index
      %c0_16 = arith.constant 0 : index
      %24 = vector.load %arg7[%c0_15, %c0_16] : memref<1x128xf32, #tpu.memory_space<vmem>>, vector<1x128xf32>
      %25 = arith.mulf %17, %17 : vector<128x128xf32>
      %cst_17 = arith.constant dense<0.000000e+00> : vector<128xf32>
      %26 = vector.multi_reduction <add>, %25, %cst_17 [0] : vector<128x128xf32> to vector<128xf32>
      %27 = vector.shape_cast %26 : vector<128xf32> to vector<1x128xf32>
      %28 = arith.addf %24, %27 : vector<1x128xf32>
      %c0_18 = arith.constant 0 : index
      %c0_19 = arith.constant 0 : index
      %29 = vector.load %arg7[%c0_18, %c0_19] : memref<1x128xf32, #tpu.memory_space<vmem>>, vector<1x128xf32>
      tpu.vector_store %arg7[%c0_18, %c0_19], %28 {strides = array<i32>} : memref<1x128xf32, #tpu.memory_space<vmem>>, vector<1x128xf32>,
    } else {
    }
    %c1_i32 = arith.constant 1 : i32
    %8 = arith.cmpi eq, %arg0, %c1_i32 : i32
    %c0_i32_4 = arith.constant 0 : i32
    %9 = arith.cmpi eq, %arg1, %c0_i32_4 : i32
    %10 = arith.andi %8, %9 : i1
    %11 = arith.extui %10 : i1 to i32
    %c0_i32_5 = arith.constant 0 : i32
    %12 = arith.cmpi ne, %11, %c0_i32_5 : i32
    scf.if %12 {
      %c0 = arith.constant 0 : index
      %c0_8 = arith.constant 0 : index
      %16 = vector.load %arg6[%c0, %c0_8] : memref<1x128xf32, #tpu.memory_space<vmem>>, vector<1x128xf32>
      %c4_i32 = arith.constant 4 : i32
      %17 = tpu.dynamic_rotate %16 by %c4_i32 dim 1 : vector<1x128xf32>, i32 -> vector<1x128xf32>
      %18 = arith.addf %16, %17 : vector<1x128xf32>
      %c8_i32 = arith.constant 8 : i32
      %19 = tpu.dynamic_rotate %18 by %c8_i32 dim 1 : vector<1x128xf32>, i32 -> vector<1x128xf32>
      %20 = arith.addf %18, %19 : vector<1x128xf32>
      %c16_i32 = arith.constant 16 : i32
      %21 = tpu.dynamic_rotate %20 by %c16_i32 dim 1 : vector<1x128xf32>, i32 -> vector<1x128xf32>
      %22 = arith.addf %20, %21 : vector<1x128xf32>
      %c32_i32 = arith.constant 32 : i32
      %23 = tpu.dynamic_rotate %22 by %c32_i32 dim 1 : vector<1x128xf32>, i32 -> vector<1x128xf32>
      %24 = arith.addf %22, %23 : vector<1x128xf32>
      %c64_i32 = arith.constant 64 : i32
      %25 = tpu.dynamic_rotate %24 by %c64_i32 dim 1 : vector<1x128xf32>, i32 -> vector<1x128xf32>
      %26 = arith.addf %24, %25 : vector<1x128xf32>
      %c0_9 = arith.constant 0 : index
      %c0_10 = arith.constant 0 : index
      %27 = vector.load %arg7[%c0_9, %c0_10] : memref<1x128xf32, #tpu.memory_space<vmem>>, vector<1x128xf32>
      %c4_i32_11 = arith.constant 4 : i32
      %28 = tpu.dynamic_rotate %27 by %c4_i32_11 dim 1 : vector<1x128xf32>, i32 -> vector<1x128xf32>
      %29 = arith.addf %27, %28 : vector<1x128xf32>
      %c8_i32_12 = arith.constant 8 : i32
      %30 = tpu.dynamic_rotate %29 by %c8_i32_12 dim 1 : vector<1x128xf32>, i32 -> vector<1x128xf32>
      %31 = arith.addf %29, %30 : vector<1x128xf32>
      %c16_i32_13 = arith.constant 16 : i32
      %32 = tpu.dynamic_rotate %31 by %c16_i32_13 dim 1 : vector<1x128xf32>, i32 -> vector<1x128xf32>
      %33 = arith.addf %31, %32 : vector<1x128xf32>
      %c32_i32_14 = arith.constant 32 : i32
      %34 = tpu.dynamic_rotate %33 by %c32_i32_14 dim 1 : vector<1x128xf32>, i32 -> vector<1x128xf32>
      %35 = arith.addf %33, %34 : vector<1x128xf32>
      %c64_i32_15 = arith.constant 64 : i32
      %36 = tpu.dynamic_rotate %35 by %c64_i32_15 dim 1 : vector<1x128xf32>, i32 -> vector<1x128xf32>
      %37 = arith.addf %35, %36 : vector<1x128xf32>
      %38 = arith.divf %26, %37 : vector<1x128xf32>
      %39 = math.sqrt %38 : vector<1x128xf32>
      %c0_16 = arith.constant 0 : index
      %40 = memref.load %arg2[%c0_16] : memref<1xf32, #tpu.memory_space<smem>>
      %41 = vector.broadcast %40 : f32 to vector<1x128xf32>
      %42 = arith.mulf %39, %41 : vector<1x128xf32>
      %c0_17 = arith.constant 0 : index
      %c0_18 = arith.constant 0 : index
      %43 = vector.load %arg8[%c0_17, %c0_18] : memref<1x128xf32, #tpu.memory_space<vmem>>, vector<1x128xf32>
      tpu.vector_store %arg8[%c0_17, %c0_18], %42 {strides = array<i32>} : memref<1x128xf32, #tpu.memory_space<vmem>>, vector<1x128xf32>,
    } else {
    }
    %c1_i32_6 = arith.constant 1 : i32
    %13 = arith.cmpi eq, %arg0, %c1_i32_6 : i32
    %14 = arith.extui %13 : i1 to i32
    %c0_i32_7 = arith.constant 0 : i32
    %15 = arith.cmpi ne, %14, %c0_i32_7 : i32
    scf.if %15 {
      %c0 = arith.constant 0 : index
      %c0_8 = arith.constant 0 : index
      %16 = vector.load %arg3[%c0, %c0_8] : memref<128x128xf32, #tpu.memory_space<vmem>>, vector<128x128xf32>
      %c0_9 = arith.constant 0 : index
      %c0_10 = arith.constant 0 : index
      %17 = vector.load %arg8[%c0_9, %c0_10] : memref<1x128xf32, #tpu.memory_space<vmem>>, vector<1x128xf32>
      %c0_11 = arith.constant 0 : index
      %c0_12 = arith.constant 0 : index
      %18 = vector.load %arg4[%c0_11, %c0_12] : memref<128x128xf32, #tpu.memory_space<vmem>>, vector<128x128xf32>
      %19 = vector.broadcast %17 : vector<1x128xf32> to vector<128x128xf32>
      %20 = arith.mulf %19, %18 : vector<128x128xf32>
      %21 = arith.addf %16, %20 : vector<128x128xf32>
      %c0_13 = arith.constant 0 : index
      %c0_14 = arith.constant 0 : index
      %22 = vector.load %arg5[%c0_13, %c0_14] : memref<128x128xf32, #tpu.memory_space<vmem>>, vector<128x128xf32>
      tpu.vector_store %arg5[%c0_13, %c0_14], %21 {strides = array<i32>} : memref<128x128xf32, #tpu.memory_space<vmem>>, vector<128x128xf32>,
    } else {
    }
    return
  }
  func.func @transform_0(%arg0: i32, %arg1: i32) -> i32 {
    %c0_i32 = arith.constant 0 : i32
    %c0_i32_0 = arith.constant 0 : i32
    return %c0_i32 : i32
  }
  func.func @transform_1(%arg0: i32, %arg1: i32) -> (i32, i32) {
    %c0_i32 = arith.constant 0 : i32
    %c0_i32_0 = arith.constant 0 : i32
    return %arg1, %c0_i32 : i32, i32
  }
  func.func @transform_2(%arg0: i32, %arg1: i32) -> (i32, i32) {
    %c0_i32 = arith.constant 0 : i32
    %c0_i32_0 = arith.constant 0 : i32
    return %arg1, %c0_i32 : i32, i32
  }
  func.func @transform_3(%arg0: i32, %arg1: i32) -> (i32, i32) {
    %0 = arith.muli %arg1, %arg0 : i32
    %c0_i32 = arith.constant 0 : i32
    %c0_i32_0 = arith.constant 0 : i32
    return %0, %c0_i32 : i32, i32
  }
}

</mosaic_0001>

<bundles_post_ra>
// kernel: tpu_custom_call.1
= control target key start
LH: loop header
LB: loop body
LE: loop exit
PB: predicated region body
PF: predicated region fallthrough
CT: control target
= control target key end

     0   :  { %s938_s0 = inlined_call_operand.<no memory space> [shape: f32[1], index: 0, kind: input, shape index: {}]   ;;  %s939_s1 = inlined_call_operand.hbm [shape: f32[128,128], index: 1, kind: input, shape index: {}]   ;;  %s940_s2 = inlined_call_operand.hbm [shape: f32[128,128], index: 2, kind: input, shape index: {}]   ;;  %s941_s3 = inlined_call_operand.hbm [shape: f32[128,128], index: 3, kind: output, shape index: {}]  }
   0x1   :  { %8 = sst [smem:[#allocation5]] %s938_s0 }
   0x2   :  { %9 = vsyncpa [#allocation7], 0 }
   0x3   :  { %10 = vsyncpa [#allocation10], 0 }
   0x4   :  { %11 = vsyncpa [#allocation8], 0 }
   0x5   :  { %13 = vsyncpa [#allocation8 + $0x1], 0  ;;  %s847_s14 = smov 0   ;;  %s849_s15 = smov 0  }
   0x6   :  { %s851_s16 = smov 0  }
   0x7 LB: > { %s597_s0 = sadd.s32 4294967295, %s809_s16   ;;  %s598_s17 = sadd.s32 4294967294, %s809_s16   ;;  %s809_s16 = sphi %s851_s16, %s19_s16   ;;  %s805_s15 = sphi %s849_s15, %s945_s15   ;;  %s801_s14 = sphi %s847_s14, %s944_s14  }
   0x8   : > { %s31_s18 = sadd.s32 1, %s805_s15  ;;  %p599_p0 = scmp.ge.s32.totalorder %s809_s16, 1 }
   0x9   : > { %p33_p1 = scmp.ge.s32.totalorder %s31_s18, 2  ;;  %p137_p2 = scmp.lt.s32.totalorder %s809_s16, 3 }
   0xa   : > { %p869_p3 = scmp.eq.s32.totalorder %s597_s0, 0  ;;  %s154_s23 = sshll.u32 %s939_s1, 4  ;;  %s155_s23 = int_to_ptr.hbm [resolvable:$true] %s154_s23 }
   0xb   : > { %s947_s18 = smov (%p33_p1, %s31_s18), 0  ;;  %p875_p4 = pnand %p599_p0, %p137_p2 }
   0xc   : > { %s811_s24 = smov [#allocation6]   ;;  %s171_s28 = sshll.u32 %s940_s2, 4  ;;  %s172_s28 = int_to_ptr.hbm [resolvable:$true] %s171_s28 }
   0xd   : > { %p627_p5 = pneg %p875_p4  ;;  %s156_s25 = sshll.u32 %s811_s24, 4  ;;  %s157_s25 = int_to_ptr.vmem [resolvable:$true] %s156_s25 }
   0xe   : > { %s812_s29 = smov 128   ;;  %s813_s30 = smov 8  }
   0xf   : > { %p628_p6 = pnand %p869_p3, %p627_p5  ;;  %s814_s4 = smov [#allocation9]  }
  0x10   : > { %s173_s5 = sshll.u32 %s814_s4, 4  ;;  %189 = sbr.rel (%p875_p4) target bundleno = 722 (0x2d2), region = 32  ;;  %s174_s5 = int_to_ptr.vmem [resolvable:$true] %s173_s5 }
  0x11   : > { %630 = dma.hbm_to_vmem [thread:$0]  (!%p628_p6), %s155_s23, 2048, %s157_s25, [#allocation7], %s812_s29, %s812_s29, %s813_s30  }
  0x12   : > { %633 = dma.hbm_to_vmem [thread:$0]  (!%p628_p6), %s172_s28, 2048, %s174_s5, [#allocation10], %s812_s29, %s812_s29, %s813_s30  }
  0x15   : > { %788 = dma.done.wait (%p869_p3), [#allocation7], 2048  }
  0x16   : > { %790 = vsyncadd (%p869_p3), [#allocation7], 4294965248 }
  0x17   : > { %792 = dma.done.wait (%p869_p3), [#allocation10], 2048  }
  0x18   : > { %794 = vsyncadd (%p869_p3), [#allocation10], 4294965248  ;;  %p218_p7 = scmp.eq.s32.totalorder %s801_s14, 0 }
  0x19   : > { %v815_v0 = vmov (%p218_p7), 0.0  }
  0x1a   : > { %223 = sbr.rel (!%p218_p7) target bundleno = 31 (0x1f), region = 44  ;;  %224 = vst [vmem:[#allocation2] sm:$0x1] (%p218_p7), %v815_v0 }
  0x1b   : > { %225 = vst [vmem:[#allocation3] sm:$0x1] (%p218_p7), %v815_v0 }
  0x1f PF: > { %p606_p8 = scmp.ne.s32.totalorder %s801_s14, 0 }
  0x21   : > { %228 = sbr.rel (%p606_p8) target bundleno = 88 (0x58), region = 48 }
  0x26   : > { %v229_v1 = vld [vmem:[#allocation6] sm:$0xff]  ;;  %v230_v2 = vld [vmem:[#allocation6 + $0x8] sm:$0xff]  ;;  %v231_v3 = vld [vmem:[#allocation6 + $0x10] sm:$0xff] }
  0x27   : > { %v232_v4 = vld [vmem:[#allocation6 + $0x18] sm:$0xff]  ;;  %v262_v5 = vmul.f32 %v229_v1, %v229_v1  ;;  %v263_v6 = vmul.f32 %v230_v2, %v230_v2  ;;  %v264_v7 = vmul.f32 %v231_v3, %v231_v3  ;;  %v233_v8 = vld [vmem:[#allocation6 + $0x20] sm:$0xff]  ;;  %v234_v11 = vld [vmem:[#allocation6 + $0x28] sm:$0xff] }
  0x28   : > { %v265_v9 = vmul.f32 %v232_v4, %v232_v4  ;;  %v266_v12 = vmul.f32 %v233_v8, %v233_v8  ;;  %v245_v14 = vld [vmem:[#allocation9] sm:$0xff]  ;;  %v235_v15 = vld [vmem:[#allocation6 + $0x30] sm:$0xff]  ;;  %v246_v16 = vld [vmem:[#allocation9 + $0x8] sm:$0xff]  ;;  %v267_v19 = vmul.f32 %v234_v11, %v234_v11 }
  0x29   : > { %v278_v10 = vadd.f32 %v263_v6, %v262_v5  ;;  %v247_v17 = vld [vmem:[#allocation9 + $0x10] sm:$0xff]  ;;  %v302_v18 = vmul.f32 %v245_v14, %v245_v14  ;;  %v248_v21 = vld [vmem:[#allocation9 + $0x18] sm:$0xff]  ;;  %v303_v22 = vmul.f32 %v246_v16, %v246_v16  ;;  %v268_v25 = vmul.f32 %v235_v15, %v235_v15  ;;  %v249_v27 = vld [vmem:[#allocation9 + $0x20] sm:$0xff] }
  0x2a   : > { %v236_v23 = vld [vmem:[#allocation6 + $0x38] sm:$0xff]  ;;  %v304_v24 = vmul.f32 %v247_v17, %v247_v17  ;;  %v237_v28 = vld [vmem:[#allocation6 + $0x40] sm:$0xff]  ;;  %v305_v29 = vmul.f32 %v248_v21, %v248_v21  ;;  %v250_v33 = vld [vmem:[#allocation9 + $0x28] sm:$0xff]  ;;  %v306_v35 = vmul.f32 %v249_v27, %v249_v27 }
  0x2b   : > { %v279_v13 = vadd.f32 %v278_v10, %v264_v7  ;;  %v318_v30 = vadd.f32 %v303_v22, %v302_v18  ;;  %v269_v31 = vmul.f32 %v236_v23, %v236_v23  ;;  %v238_v34 = vld [vmem:[#allocation6 + $0x48] sm:$0xff]  ;;  %v270_v37 = vmul.f32 %v237_v28, %v237_v28  ;;  %v251_v39 = vld [vmem:[#allocation9 + $0x30] sm:$0xff]  ;;  %v252_v45 = vld [vmem:[#allocation9 + $0x38] sm:$0xff] }
  0x2c   : > { %v239_v40 = vld [vmem:[#allocation6 + $0x50] sm:$0xff]  ;;  %v307_v41 = vmul.f32 %v250_v33, %v250_v33  ;;  %v271_v43 = vmul.f32 %v238_v34, %v238_v34  ;;  %v240_v46 = vld [vmem:[#allocation6 + $0x58] sm:$0xff]  ;;  %v308_v47 = vmul.f32 %v251_v39, %v251_v39  ;;  %v253_v51 = vld [vmem:[#allocation9 + $0x40] sm:$0xff]  ;;  %v309_v53 = vmul.f32 %v252_v45, %v252_v45 }
  0x2d   : > { %v280_v20 = vadd.f32 %v279_v13, %v265_v9  ;;  %v319_v36 = vadd.f32 %v318_v30, %v304_v24  ;;  %v272_v49 = vmul.f32 %v239_v40, %v239_v40  ;;  %v241_v52 = vld [vmem:[#allocation6 + $0x60] sm:$0xff]  ;;  %v273_v55 = vmul.f32 %v240_v46, %v240_v46  ;;  %v254_v57 = vld [vmem:[#allocation9 + $0x48] sm:$0xff]  ;;  %v255_v63 = vld [vmem:[#allocation9 + $0x50] sm:$0xff] }
  0x2e   : > { %v242_v58 = vld [vmem:[#allocation6 + $0x68] sm:$0xff]  ;;  %v310_v59 = vmul.f32 %v253_v51, %v253_v51  ;;  %v274_v61 = vmul.f32 %v241_v52, %v241_v52  ;;  %v243_v0 = vld [vmem:[#allocation6 + $0x70] sm:$0xff]  ;;  %v311_v1 = vmul.f32 %v254_v57, %v254_v57  ;;  %v256_v5 = vld [vmem:[#allocation9 + $0x58] sm:$0xff]  ;;  %v312_v7 = vmul.f32 %v255_v63, %v255_v63 }
  0x2f   : > { %v281_v26 = vadd.f32 %v280_v20, %v266_v12  ;;  %v320_v42 = vadd.f32 %v319_v36, %v305_v29  ;;  %v275_v3 = vmul.f32 %v242_v58, %v242_v58  ;;  %v244_v6 = vld [vmem:[#allocation6 + $0x78] sm:$0xff]  ;;  %v276_v9 = vmul.f32 %v243_v0, %v243_v0  ;;  %v257_v11 = vld [vmem:[#allocation9 + $0x60] sm:$0xff]  ;;  %v258_v16 = vld [vmem:[#allocation9 + $0x68] sm:$0xff] }
  0x30   : > { %v313_v12 = vmul.f32 %v256_v5, %v256_v5  ;;  %v277_v14 = vmul.f32 %v244_v6, %v244_v6  ;;  %v314_v17 = vmul.f32 %v257_v11, %v257_v11  ;;  %v259_v20 = vld [vmem:[#allocation9 + $0x70] sm:$0xff]  ;;  %v315_v21 = vmul.f32 %v258_v16, %v258_v16  ;;  %v260_v24 = vld [vmem:[#allocation9 + $0x78] sm:$0xff] }
  0x31   : > { %v282_v32 = vadd.f32 %v281_v26, %v267_v19  ;;  %v321_v48 = vadd.f32 %v320_v42, %v306_v35  ;;  %v317_v28 = vmul.f32 %v260_v24, %v260_v24 }
  0x33   : > { %v283_v38 = vadd.f32 %v282_v32, %v268_v25  ;;  %v322_v54 = vadd.f32 %v321_v48, %v307_v41  ;;  %v316_v25 = vmul.f32 %v259_v20, %v259_v20 }
  0x35   : > { %v284_v44 = vadd.f32 %v283_v38, %v269_v31  ;;  %v323_v60 = vadd.f32 %v322_v54, %v308_v47 }
  0x37   : > { %v285_v50 = vadd.f32 %v284_v44, %v270_v37  ;;  %v324_v2 = vadd.f32 %v323_v60, %v309_v53  ;;  %v261_v37 = vld [vmem:[#allocation2] sm:$0x1]  ;;  %v301_v44 = vld [vmem:[#allocation3] sm:$0x1] }
  0x39   : > { %v286_v56 = vadd.f32 %v285_v50, %v271_v43  ;;  %v325_v8 = vadd.f32 %v324_v2, %v310_v59 }
  0x3b   : > { %v287_v62 = vadd.f32 %v286_v56, %v272_v49  ;;  %v326_v13 = vadd.f32 %v325_v8, %v311_v1 }
  0x3d   : > { %v288_v4 = vadd.f32 %v287_v62, %v273_v55  ;;  %v327_v18 = vadd.f32 %v326_v13, %v312_v7 }
  0x3f   : > { %v289_v10 = vadd.f32 %v288_v4, %v274_v61  ;;  %v328_v22 = vadd.f32 %v327_v18, %v313_v12 }
  0x41   : > { %v290_v15 = vadd.f32 %v289_v10, %v275_v3  ;;  %v329_v26 = vadd.f32 %v328_v22, %v314_v17 }
  0x43   : > { %v291_v19 = vadd.f32 %v290_v15, %v276_v9  ;;  %v330_v29 = vadd.f32 %v329_v26, %v315_v21 }
  0x45   : > { %v292_v23 = vadd.f32 %v291_v19, %v277_v14  ;;  %v331_v31 = vadd.f32 %v330_v29, %v316_v25 }
  0x47   : > { %v293_v27 = vrot.slane %v292_v23, 4  ;;  %v332_v33 = vadd.f32 %v331_v31, %v317_v28 }
  0x49   : > { %v294_v30 = vadd.f32 %v293_v27, %v292_v23  ;;  %v333_v35 = vrot.slane %v332_v33, 4 }
  0x4b   : > { %v295_v32 = vrot.slane %v294_v30, 2  ;;  %v334_v38 = vadd.f32 %v333_v35, %v332_v33 }
  0x4d   : > { %v296_v34 = vadd.f32 %v295_v32, %v294_v30  ;;  %v335_v40 = vrot.slane %v334_v38, 2 }
  0x4f   : > { %v297_v36 = vrot.slane %v296_v34, 1  ;;  %v336_v42 = vadd.f32 %v335_v40, %v334_v38 }
  0x51   : > { %v298_v39 = vadd.f32 %v297_v36, %v296_v34  ;;  %v337_v43 = vrot.slane %v336_v42, 1 }
  0x53   : > { %v299_v41 = vadd.f32 %v298_v39, %v261_v37  ;;  %v338_v45 = vadd.f32 %v337_v43, %v336_v42 }
  0x55   : > { %300 = vst [vmem:[#allocation2] sm:$0x1] %v299_v41  ;;  %v339_v46 = vadd.f32 %v338_v45, %v301_v44 }
  0x57   : > { %340 = vst [vmem:[#allocation3] sm:$0x1] %v339_v46 }
  0x58 PF: > { %p341_p9 = scmp.eq.s32.totalorder %s801_s14, 1 }
  0x59   : > { %s816_s6 = smov (%p341_p9), 4   ;;  %s817_s7 = smov (%p341_p9), 8  }
  0x5a   : > { %345 = sbr.rel (!%p341_p9) target bundleno = 690 (0x2b2), region = 52  ;;  %s818_s8 = smov (%p341_p9), 16  }
  0x5b   : > { %s819_s9 = smov (%p341_p9), 32   ;;  %s820_s10 = smov (%p341_p9), 64  }
  0x5c   : > { %v346_v48 = vld [vmem:[#allocation2] sm:$0x1] (%p341_p9)  ;;  %s405_s11 = sld [smem:[#allocation5]] (%p341_p9) }
  0x5e   : > { %v362_v47 = vld [vmem:[#allocation3] sm:$0x1] (%p341_p9) }
  0x5f   : > { %363 = vrot.lane.b32.xlu0 %v362_v47, %s816_s6 }
  0x62   : > { %v406_v23 = vstv %s405_s11 }
  0x67   : > { %347 = vrot.lane.b32.xlu0 %v346_v48, %s816_s6 }
  0xd1   : > { %v364_v49 = vpop.permute.xlu0 %363 }
  0xd2   : > { %v365_v50 = vadd.f32 %v364_v49, %v362_v47 }
  0xd4   : > { %366 = vrot.lane.b32.xlu1 %v365_v50, %s817_s7 }
  0xd9   : > { %v348_v51 = vpop.permute.xlu0 %347 }
  0xda   : > { %v349_v52 = vadd.f32 %v348_v51, %v346_v48 }
  0xdc   : > { %350 = vrot.lane.b32.xlu1 %v349_v52, %s817_s7 }
 0x146   : > { %v367_v53 = vpop.permute.xlu1 %366 }
 0x147   : > { %v368_v54 = vadd.f32 %v367_v53, %v365_v50 }
 0x149   : > { %369 = vrot.lane.b32.xlu2 %v368_v54, %s818_s8 }
 0x14e   : > { %v351_v55 = vpop.permute.xlu1 %350 }
 0x14f   : > { %v352_v56 = vadd.f32 %v351_v55, %v349_v52 }
 0x151   : > { %353 = vrot.lane.b32.xlu2 %v352_v56, %s818_s8 }
 0x1a3   : > { %v370_v57 = vpop.permute.xlu2 %369 }
 0x1a4   : > { %v371_v58 = vadd.f32 %v370_v57, %v368_v54 }
 0x1a6   : > { %372 = vrot.lane.b32.xlu0 %v371_v58, %s819_s9 }
 0x1ab   : > { %v354_v59 = vpop.permute.xlu2 %353 }
 0x1ac   : > { %v355_v60 = vadd.f32 %v354_v59, %v352_v56 }
 0x1ae   : > { %356 = vrot.lane.b32.xlu1 %v355_v60, %s819_s9 }
 0x218   : > { %v373_v61 = vpop.permute.xlu0 %372 }
 0x219   : > { %v374_v62 = vadd.f32 %v373_v61, %v371_v58 }
 0x21b   : > { %375 = vrot.lane.b32.xlu2 %v374_v62, %s820_s10 }
 0x220   : > { %v357_v63 = vpop.permute.xlu1 %356 }
 0x221   : > { %v358_v0 = vadd.f32 %v357_v63, %v355_v60 }
 0x223   : > { %359 = vrot.lane.b32.xlu0 %v358_v0, %s820_s10 }
 0x275   : > { %v376_v1 = vpop.permute.xlu2 %375 }
 0x276   : > { %v377_v2 = vadd.f32 %v376_v1, %v374_v62 }
 0x278   : > { %682 = vrcp.f32 %v377_v2  ;;  %v389_v8 = vand.u32 2147483648, %v377_v2  ;;  %vm383_vm1 = vweird.f32 %v377_v2  ;;  %v387_v9 = vand.u32 2147483647, %v377_v2 }
 0x27a   : > { %v390_v11 = vor.u32 1.1754944e-38, %v389_v8  ;;  %vm388_vm3 = vcmp.eq.f32.partialorder %v387_v9, 8.507059e+37 }
 0x27e   : > { %v683_v3 = vpop.eup %682 }
 0x27f   : > { %v379_v4 = vmul.f32 %v683_v3, %v377_v2  ;;  %vm384_vm0 = vweird.f32 %v683_v3 }
 0x280   : > { %vm385_vm2 = vmor %vm383_vm1, %vm384_vm0 }
 0x281   : > { %v380_v5 = vsub.f32 1.0, %v379_v4 }
 0x283   : > { %v381_v6 = vmul.f32 %v683_v3, %v380_v5 }
 0x285   : > { %v382_v7 = vadd.f32 %v683_v3, %v381_v6 }
 0x287   : > { %v386_v10 = vsel %vm385_vm2, %v683_v3, %v382_v7 }
 0x288   : > { %v391_v14 = vsel %vm388_vm3, %v390_v11, %v386_v10 }
 0x295   : > { %v360_v12 = vpop.permute.xlu0 %359 }
 0x296   : > { %v361_v13 = vadd.f32 %v360_v12, %v358_v0 }
 0x298   : > { %v392_v15 = vmul.f32 %v391_v14, %v361_v13 }
 0x29a   : > { %684 = vrsqrt.f32 %v392_v15  ;;  %vm400_vm4 = vcmp.eq.f32.partialorder %v392_v15, inf  ;;  %v403_v24 = vand.u32 2147483648, %v392_v15  ;;  %vm402_vm5 = vcmp.eq.f32.partialorder %v392_v15, 0.0 }
 0x2a0   : > { %v685_v16 = vpop.eup %684 }
 0x2a1   : > { %v394_v17 = vmul.f32 %v685_v16, %v392_v15 }
 0x2a3   : > { %v395_v18 = vmul.f32 %v685_v16, %v394_v17 }
 0x2a5   : > { %v396_v19 = vmul.f32 0.5, %v395_v18 }
 0x2a7   : > { %v397_v20 = vsub.f32 1.5, %v396_v19 }
 0x2a9   : > { %v398_v21 = vmul.f32 %v685_v16, %v397_v20 }
 0x2ab   : > { %v399_v22 = vmul.f32 %v398_v21, %v392_v15 }
 0x2ad   : > { %v401_v25 = vsel %vm400_vm4, %v392_v15, %v399_v22 }
 0x2ae   : > { %v404_v26 = vsel %vm402_vm5, %v403_v24, %v401_v25 }
 0x2af   : > { %v407_v27 = vmul.f32 %v406_v23, %v404_v26 }
 0x2b1   : > { %408 = vst [vmem:[#allocation4] sm:$0x1] %v407_v27 }
 0x2b2 PF: > { %p608_p10 = scmp.ne.s32.totalorder %s801_s14, 1 }
 0x2b4   : > { %411 = sbr.rel (%p608_p10) target bundleno = 718 (0x2ce), region = 56 }
 0x2b9   : > { %v429_v28 = vld [vmem:[#allocation9] sm:$0xff]  ;;  %v903_v30 = vld [vmem:[#allocation4] ss:$0 sm:$0xff]  ;;  %v430_v31 = vld [vmem:[#allocation9 + $0x8] sm:$0xff] }
 0x2ba   : > { %v412_v29 = vld [vmem:[#allocation6] sm:$0xff]  ;;  %v413_v32 = vld [vmem:[#allocation6 + $0x8] sm:$0xff]  ;;  %v414_v33 = vld [vmem:[#allocation6 + $0x10] sm:$0xff]  ;;  %v448_v35 = vmul.f32 %v903_v30, %v429_v28  ;;  %v449_v36 = vmul.f32 %v903_v30, %v430_v31 }
 0x2bb   : > { %v431_v34 = vld [vmem:[#allocation9 + $0x10] sm:$0xff]  ;;  %v415_v38 = vld [vmem:[#allocation6 + $0x18] sm:$0xff]  ;;  %v433_v40 = vld [vmem:[#allocation9 + $0x20] sm:$0xff] }
 0x2bc   : > { %v450_v37 = vmul.f32 %v903_v30, %v431_v34  ;;  %v432_v39 = vld [vmem:[#allocation9 + $0x18] sm:$0xff]  ;;  %v416_v42 = vld [vmem:[#allocation6 + $0x20] sm:$0xff]  ;;  %v452_v43 = vmul.f32 %v903_v30, %v433_v40  ;;  %v434_v44 = vld [vmem:[#allocation9 + $0x28] sm:$0xff]  ;;  %v464_v45 = vadd.f32 %v448_v35, %v412_v29  ;;  %v465_v46 = vadd.f32 %v449_v36, %v413_v32 }
 0x2bd   : > { %v451_v41 = vmul.f32 %v903_v30, %v432_v39  ;;  %v417_v48 = vld [vmem:[#allocation6 + $0x28] sm:$0xff]  ;;  %v453_v49 = vmul.f32 %v903_v30, %v434_v44  ;;  %v435_v50 = vld [vmem:[#allocation9 + $0x30] sm:$0xff]  ;;  %v436_v51 = vld [vmem:[#allocation9 + $0x38] sm:$0xff] }
 0x2be   : > { %v466_v47 = vadd.f32 %v450_v37, %v414_v33  ;;  %v418_v53 = vld [vmem:[#allocation6 + $0x30] sm:$0xff]  ;;  %v454_v54 = vmul.f32 %v903_v30, %v435_v50  ;;  %v455_v55 = vmul.f32 %v903_v30, %v436_v51  ;;  %v437_v56 = vld [vmem:[#allocation9 + $0x40] sm:$0xff]  ;;  %480 = vst [vmem:[#allocation11] sm:$0xff] %v464_v45  ;;  %v468_v57 = vadd.f32 %v452_v43, %v416_v42  ;;  %v419_v58 = vld [vmem:[#allocation6 + $0x38] sm:$0xff] }
 0x2bf   : > { %v467_v52 = vadd.f32 %v451_v41, %v415_v38  ;;  %v456_v59 = vmul.f32 %v903_v30, %v437_v56  ;;  %v438_v60 = vld [vmem:[#allocation9 + $0x48] sm:$0xff]  ;;  %v439_v61 = vld [vmem:[#allocation9 + $0x50] sm:$0xff]  ;;  %481 = vst [vmem:[#allocation11 + $0x8] sm:$0xff] %v465_v46  ;;  %v469_v62 = vadd.f32 %v453_v49, %v417_v48  ;;  %v420_v63 = vld [vmem:[#allocation6 + $0x40] sm:$0xff] }
 0x2c0   : > { %v457_v0 = vmul.f32 %v903_v30, %v438_v60  ;;  %v440_v1 = vld [vmem:[#allocation9 + $0x58] sm:$0xff]  ;;  %482 = vst [vmem:[#allocation11 + $0x10] sm:$0xff] %v466_v47  ;;  %v470_v2 = vadd.f32 %v454_v54, %v418_v53  ;;  %v421_v3 = vld [vmem:[#allocation6 + $0x48] sm:$0xff]  ;;  %v458_v4 = vmul.f32 %v903_v30, %v439_v61  ;;  %v441_v5 = vld [vmem:[#allocation9 + $0x60] sm:$0xff]  ;;  %v471_v7 = vadd.f32 %v455_v55, %v419_v58 }
 0x2c1   : > { %v442_v6 = vld [vmem:[#allocation9 + $0x68] sm:$0xff]  ;;  %483 = vst [vmem:[#allocation11 + $0x18] sm:$0xff] %v467_v52  ;;  %v422_v8 = vld [vmem:[#allocation6 + $0x50] sm:$0xff]  ;;  %v459_v9 = vmul.f32 %v903_v30, %v440_v1  ;;  %v472_v11 = vadd.f32 %v456_v59, %v420_v63  ;;  %v423_v12 = vld [vmem:[#allocation6 + $0x58] sm:$0xff]  ;;  %v460_v13 = vmul.f32 %v903_v30, %v441_v5 }
 0x2c2   : > { %v443_v10 = vld [vmem:[#allocation9 + $0x70] sm:$0xff]  ;;  %484 = vst [vmem:[#allocation11 + $0x20] sm:$0xff] %v468_v57  ;;  %v444_v14 = vld [vmem:[#allocation9 + $0x78] sm:$0xff]  ;;  %v473_v15 = vadd.f32 %v457_v0, %v421_v3  ;;  %v424_v16 = vld [vmem:[#allocation6 + $0x60] sm:$0xff]  ;;  %v461_v17 = vmul.f32 %v903_v30, %v442_v6  ;;  %v474_v18 = vadd.f32 %v458_v4, %v422_v8 }
 0x2c3   : > { %485 = vst [vmem:[#allocation11 + $0x28] sm:$0xff] %v469_v62  ;;  %v425_v19 = vld [vmem:[#allocation6 + $0x68] sm:$0xff]  ;;  %v462_v20 = vmul.f32 %v903_v30, %v443_v10  ;;  %v475_v21 = vadd.f32 %v459_v9, %v423_v12  ;;  %v426_v22 = vld [vmem:[#allocation6 + $0x70] sm:$0xff]  ;;  %v463_v23 = vmul.f32 %v903_v30, %v444_v14  ;;  %v476_v24 = vadd.f32 %v460_v13, %v424_v16  ;;  %v427_v25 = vld [vmem:[#allocation6 + $0x78] sm:$0xff] }
 0x2c4   : > { %486 = vst [vmem:[#allocation11 + $0x30] sm:$0xff] %v470_v2  ;;  %v477_v26 = vadd.f32 %v461_v17, %v425_v19 }
 0x2c5   : > { %487 = vst [vmem:[#allocation11 + $0x38] sm:$0xff] %v471_v7  ;;  %v478_v27 = vadd.f32 %v462_v20, %v426_v22  ;;  %v479_v28 = vadd.f32 %v463_v23, %v427_v25 }
 0x2c6   : > { %488 = vst [vmem:[#allocation11 + $0x40] sm:$0xff] %v472_v11 }
 0x2c7   : > { %489 = vst [vmem:[#allocation11 + $0x48] sm:$0xff] %v473_v15 }
 0x2c8   : > { %490 = vst [vmem:[#allocation11 + $0x50] sm:$0xff] %v474_v18 }
 0x2c9   : > { %491 = vst [vmem:[#allocation11 + $0x58] sm:$0xff] %v475_v21 }
 0x2ca   : > { %492 = vst [vmem:[#allocation11 + $0x60] sm:$0xff] %v476_v24 }
 0x2cb   : > { %493 = vst [vmem:[#allocation11 + $0x68] sm:$0xff] %v477_v26 }
 0x2cc   : > { %494 = vst [vmem:[#allocation11 + $0x70] sm:$0xff] %v478_v27 }
 0x2cd   : > { %495 = vst [vmem:[#allocation11 + $0x78] sm:$0xff] %v479_v28 }
 0x2ce PF: > { %p642_p11 = scmp.eq.s32.totalorder %s597_s0, 1  ;;  %s512_s14 = sshll.u32 %s941_s3, 4  ;;  %s513_s14 = int_to_ptr.hbm [resolvable:$true] %s512_s14 }
 0x2cf   : > { %s821_s19 = smov [#allocation11]   ;;  %s822_s21 = smov 128  }
 0x2d0   : > { %s510_s20 = sshll.u32 %s821_s19, 4  ;;  %s823_s22 = smov 8   ;;  %s511_s20 = int_to_ptr.vmem [resolvable:$true] %s510_s20 }
 0x2d1   : > { %624 = dma.vmem_to_hbm [thread:$0]  (%p642_p11), %s511_s20, 2048, %s513_s14, [#allocation8], %s822_s21, %s822_s21, %s823_s22  }
 0x2d2 PF: > { %p643_p12 = scmp.ge.s32.totalorder %s809_s16, 2  ;;  %p644_p13 = scmp.eq.s32.totalorder %s598_s17, 1 }
 0x2d4   : > { %p635_p0 = pnand %p644_p13, %p643_p12 }
 0x2d6   : > { %p636_p1 = pneg %p635_p0 }
 0x2d8   : > { %796 = dma.done.wait (%p636_p1), [#allocation8], 2048  }
 0x2d9   : > { %798 = vsyncadd (%p636_p1), [#allocation8], 4294965248  ;;  %s19_s16 = sadd.s32 1, %s809_s16   ;;  %s944_s14 = smov %s805_s15 }
 0x2da   : > { %p16_p2 = scmp.ge.s32.totalorder %s19_s16, 4   ;;  %s945_s15 = smov %s947_s18 }
 0x2dc   :  { %18 = sbr.rel (!%p16_p2) target bundleno = 7 (0x7), region = 91 }
 0x2e1   :  { %534 = vsyncpa [#allocation7], 1 }
 0x2e2   :  { %536 = vsyncpa [#allocation7 + $0x1], 1 }
 0x2e3   :  { %537 = vsyncpa [#allocation10], 1 }
 0x2e4   :  { %538 = vsyncpa [#allocation8], 1 }
 0x2e5   :  { %540 = vsyncpa [#allocation8 + $0x1], 1 }

</bundles_post_ra>
